<compile_context>
chip_gen: v6e
topology: v6e:2x2x1
jax: 0.10.0
libtpu: 0.0.40
codegen_flags: <defaults>
</compile_context>

<pallas_src>
import functools

import jax
import jax.numpy as jnp
from jax import lax
from jax.experimental import pallas as pl
from jax.experimental.pallas import tpu as pltpu


def _round_up(a, b):
    return (a + b - 1) // b * b


def _ff_kernel(x_ref, w_ref, o_ref, *, step_size, lambd):
    # x_ref: (tm, D) tile of tokens; w_ref: (D, D) full weight (VMEM-resident).
    x = x_ref[...]          # native dtype (f32 or bf16)
    w = w_ref[...]          # native dtype

    # x1 = x @ W^T  -- contract last dims; MXU handles the transpose, no w.T copy.
    x1 = lax.dot_general(
        x, w, (((1,), (1,)), ((), ())), preferred_element_type=jnp.float32
    )

    # grad_2 - grad_1 = (x - x1) @ W  (single matmul instead of two).
    x_f32 = x.astype(jnp.float32)
    t = x_f32 - x1
    grad = jnp.dot(t.astype(x.dtype), w, preferred_element_type=jnp.float32)

    out = x_f32 + step_size * grad - step_size * lambd
    o_ref[...] = jnp.maximum(out, 0.0).astype(o_ref.dtype)


def feed_forward(x, weight, *, step_size=0.1, lambd=5.0, tm=None):
    """x: (..., D) array; weight: (D, D). Returns array with x's shape/dtype."""
    orig_shape = x.shape
    D = orig_shape[-1]
    x2d = x.reshape(-1, D)
    M = x2d.shape[0]

    # Large, 8-aligned row tile; clamp for tiny inputs so we don't over-pad.
    if tm is None:
        tm = min(256, _round_up(M, 8))
    tm = max(8, _round_up(tm, 8))

    # Pad the token axis instead of asserting divisibility. Zero rows are
    # harmless (relu(-step*lambd) == 0) and are sliced off below.
    M_pad = _round_up(M, tm)
    if M_pad != M:
        x2d = jnp.pad(x2d, ((0, M_pad - M), (0, 0)))

    kernel = functools.partial(_ff_kernel, step_size=step_size, lambd=lambd)

    # VMEM budget: resident W + double-buffered in/out tiles + f32 intermediates.
    x_item = jnp.dtype(x2d.dtype).itemsize
    w_item = jnp.dtype(weight.dtype).itemsize
    vmem_need = D * D * w_item + 4 * tm * D * x_item + 4 * tm * D * 4
    vmem_limit = int(min(max(2 * vmem_need, 32 * 1024 * 1024), 64 * 1024 * 1024))

    out = pl.pallas_call(
        kernel,
        out_shape=jax.ShapeDtypeStruct((M_pad, D), x.dtype),
        grid_spec=pltpu.PrefetchScalarGridSpec(
            num_scalar_prefetch=0,
            grid=(M_pad // tm,),
            in_specs=[
                pl.BlockSpec((tm, D), lambda i: (i, 0)),   # token tile
                pl.BlockSpec((D, D), lambda i: (0, 0)),    # weight, VMEM-resident
            ],
            out_specs=pl.BlockSpec((tm, D), lambda i: (i, 0)),
        ),
        compiler_params=pltpu.CompilerParams(
            dimension_semantics=("parallel",),   # M axis shards across TCs on v7x
            vmem_limit_bytes=vmem_limit,
        ),
    )(x2d, weight)

    if M_pad != M:
        out = out[:M]
    return out.reshape(orig_shape)


def _reference(x, weight, step_size=0.1, lambd=5.0):
    x1 = x @ weight.T
    grad_1 = x1 @ weight
    grad_2 = x @ weight
    grad_update = step_size * (grad_2 - grad_1) - step_size * lambd
    return jnp.maximum(x + grad_update, 0.0)


if __name__ == "__main__":
    key = jax.random.PRNGKey(0)
    k_x, k_w = jax.random.split(key)

    batch, seq, dim = 2, 8, 32

    # Deterministic kaiming_uniform_ equivalent: bound = sqrt(6 / fan_in), fan_in = dim.
    bound = jnp.sqrt(6.0 / dim)
    weight = jax.random.uniform(
        k_w, (dim, dim), dtype=jnp.float32, minval=-bound, maxval=bound
    )
    x = jax.random.normal(k_x, (batch, seq, dim), dtype=jnp.float32)

    out = feed_forward(x, weight, step_size=0.1, lambd=5.0)
    out = jax.block_until_ready(out)

    ref = _reference(x.reshape(-1, dim), weight).reshape(batch, seq, dim)
    assert out.shape == x.shape
    assert out.dtype == x.dtype
    assert jnp.allclose(out, ref, atol=1e-4, rtol=1e-4)

    print("KERNEL_OK")
</pallas_src>

<mosaic_0001>
module attributes {stable_mosaic.version = 11 : i64} {
  func.func @_ff_kernel(%arg0: i32, %arg1: memref<16x32xf32, #tpu.memory_space<vmem>>, %arg2: memref<32x32xf32, #tpu.memory_space<vmem>>, %arg3: memref<16x32xf32, #tpu.memory_space<vmem>>) attributes {dimension_semantics = [#tpu.dimension_semantics<parallel>], iteration_bounds = array<i64: 1>, scalar_prefetch = 0 : i64, scratch_operands = 0 : i64, tpu.core_type = #tpu.core_type<tc>, window_params = [{transform_indices = @transform_0, window_bounds = array<i64: 16, 32>}, {pipeline_mode = #tpu.pipeline_mode<synchronous>, transform_indices = @transform_1, window_bounds = array<i64: 32, 32>}, {transform_indices = @transform_2, window_bounds = array<i64: 16, 32>}]} {
    %c0 = arith.constant 0 : index
    %c0_0 = arith.constant 0 : index
    %0 = vector.load %arg1[%c0, %c0_0] : memref<16x32xf32, #tpu.memory_space<vmem>>, vector<16x32xf32>
    %c0_1 = arith.constant 0 : index
    %c0_2 = arith.constant 0 : index
    %1 = vector.load %arg2[%c0_1, %c0_2] : memref<32x32xf32, #tpu.memory_space<vmem>>, vector<32x32xf32>
    %cst = arith.constant dense<0.000000e+00> : vector<16x32xf32>
    %2 = tpu.matmul %0, %1, %cst {dimension_numbers = #tpu.dot_dimension_numbers<[1], [1], [0], [0], [0, 0, 1, 0], [], []>} : vector<16x32xf32>, vector<32x32xf32>, vector<16x32xf32> -> vector<16x32xf32>
    %3 = arith.subf %0, %2 : vector<16x32xf32>
    %cst_3 = arith.constant dense<0.000000e+00> : vector<16x32xf32>
    %4 = tpu.matmul %3, %1, %cst_3 {dimension_numbers = #tpu.dot_dimension_numbers<[1], [0], [0], [1], [0, 0, 1, 1], [], []>} : vector<16x32xf32>, vector<32x32xf32>, vector<16x32xf32> -> vector<16x32xf32>
    %cst_4 = arith.constant 1.000000e-01 : f32
    %5 = vector.broadcast %cst_4 : f32 to vector<16x32xf32>
    %6 = arith.mulf %5, %4 : vector<16x32xf32>
    %7 = arith.addf %0, %6 : vector<16x32xf32>
    %cst_5 = arith.constant 5.000000e-01 : f32
    %8 = vector.broadcast %cst_5 : f32 to vector<16x32xf32>
    %9 = arith.subf %7, %8 : vector<16x32xf32>
    %cst_6 = arith.constant 0.000000e+00 : f32
    %10 = vector.broadcast %cst_6 : f32 to vector<16x32xf32>
    %11 = arith.maximumf %9, %10 : vector<16x32xf32>
    %c0_7 = arith.constant 0 : index
    %c0_8 = arith.constant 0 : index
    %12 = vector.load %arg3[%c0_7, %c0_8] : memref<16x32xf32, #tpu.memory_space<vmem>>, vector<16x32xf32>
    tpu.vector_store %arg3[%c0_7, %c0_8], %11 {strides = array<i32>} : memref<16x32xf32, #tpu.memory_space<vmem>>, vector<16x32xf32>,
    return
  }
  func.func @transform_0(%arg0: i32) -> (i32, i32) {
    %c0_i32 = arith.constant 0 : i32
    %c0_i32_0 = arith.constant 0 : i32
    return %arg0, %c0_i32 : i32, i32
  }
  func.func @transform_1(%arg0: i32) -> (i32, i32) {
    %c0_i32 = arith.constant 0 : i32
    %c0_i32_0 = arith.constant 0 : i32
    %c0_i32_1 = arith.constant 0 : i32
    return %c0_i32, %c0_i32_0 : i32, i32
  }
  func.func @transform_2(%arg0: i32) -> (i32, i32) {
    %c0_i32 = arith.constant 0 : i32
    %c0_i32_0 = arith.constant 0 : i32
    return %arg0, %c0_i32 : i32, i32
  }
}

</mosaic_0001>

<bundles_post_ra>
// kernel: tpu_custom_call.1
= control target key start
LH: loop header
LB: loop body
LE: loop exit
PB: predicated region body
PF: predicated region fallthrough
CT: control target
= control target key end

     0   :  { %7 = vsyncpa [#allocation3], 0  ;;  %s418_s0 = inlined_call_operand.hbm [shape: f32[16,32], index: 0, kind: input, shape index: {}]   ;;  %s419_s1 = inlined_call_operand.hbm [shape: f32[32,32], index: 1, kind: input, shape index: {}]   ;;  %s420_s2 = inlined_call_operand.hbm [shape: f32[16,32], index: 2, kind: output, shape index: {}]  }
   0x1   :  { %8 = vsyncpa [#allocation6], 0 }
   0x2   :  { %9 = vsyncpa [#allocation4], 0  ;;  %s366_s9 = smov [#allocation2]  }
   0x3   :  { %s15_s10 = sshll.u32 %s366_s9, 4  ;;  %s16_s10 = int_to_ptr.vmem [resolvable:$true] %s15_s10 }
   0x4   :  { %s308_s11 = scalar_lea.vmem %s16_s10, 256  ;;  %p313_p1 = scmp.lt.s32.totalorder %s16_s10, %s16_s10 }
   0x5   :  { %p309_p0 = scmp.ne.s32.totalorder %s16_s10, %s308_s11  ;;  %p314_p2 = scmp.lt.s32.totalorder %s308_s11, %s308_s11 }
   0x7   :  { %p315_p3 = por %p314_p2, %p313_p1 }
   0x9   :  { %p316_p4 = pnand %p315_p3, %p309_p0 }
   0xb   :  { %319 = shalt.err (!%p316_p4)
}
   0xc   :  { %s367_s12 = smov 128   ;;  %s368_s13 = smov 8  }
   0xd   :  { %21 = dma.hbm_to_vmem [thread:$0]  %s418_s0, 256, %s16_s10, [#allocation3], %s367_s12, %s367_s12, %s368_s13  }
   0xe   :  { %s369_s16 = smov [#allocation5]  }
   0xf   :  { %s27_s17 = sshll.u32 %s369_s16, 4  ;;  %s28_s17 = int_to_ptr.vmem [resolvable:$true] %s27_s17 }
  0x10   :  { %s328_s18 = scalar_lea.vmem %s28_s17, 512  ;;  %p333_p6 = scmp.lt.s32.totalorder %s28_s17, %s28_s17 }
  0x11   :  { %p329_p5 = scmp.ne.s32.totalorder %s28_s17, %s328_s18  ;;  %p334_p7 = scmp.lt.s32.totalorder %s328_s18, %s328_s18 }
  0x13   :  { %p335_p8 = por %p334_p7, %p333_p6 }
  0x15   :  { %p336_p9 = pnand %p335_p8, %p329_p5 }
  0x17   :  { %339 = shalt.err (!%p336_p9)
}
  0x18   :  { %33 = dma.hbm_to_vmem [thread:$0]  %s419_s1, 512, %s28_s17, [#allocation6], %s367_s12, %s367_s12, %s368_s13  }
  0x19   :  { %360 = dma.done.wait [#allocation3], 256  }
  0x1a   :  { %361 = vsyncadd [#allocation3], 4294967040 }
  0x1b   :  { %362 = dma.done.wait [#allocation6], 512  }
  0x1c   :  { %363 = vsyncadd [#allocation6], 4294966784  ;;  %vm46_vm0 = vcmask 261120   ;;  %v45_v0 = vld [vmem:[#allocation5 + $0x18] sm:$0xff]  ;;  %v44_v1 = vld [vmem:[#allocation5 + $0x10] sm:$0xff]  ;;  %s370_s0 = smov [#allocation7]  }
  0x1d   :  { %273 = vmatprep.subr.msk.mxu0 %vm46_vm0, %v45_v0  ;;  %v40_v2 = vld [vmem:[#allocation2] sm:$0xff]  ;;  %284 = vmatprep.subr.mxu1 %v45_v0  ;;  %v43_v3 = vld [vmem:[#allocation5 + $0x8] sm:$0xff]  ;;  %v42_v4 = vld [vmem:[#allocation5] sm:$0xff]  ;;  %s238_s1 = sshll.u32 %s370_s0, 4  ;;  %s239_s1 = int_to_ptr.vmem [resolvable:$true] %s238_s1 }
  0x1e   :  { %274 = vmatpush3.xpose.msk.msra.mxu0 %vm46_vm0, %v45_v0  ;;  %281 = vmatprep.mubr.msk.f32.mxu0 %vm46_vm0, %v40_v2  ;;  %v41_v5 = vld [vmem:[#allocation2 + $0x8] sm:$0xff]  ;;  %s340_s21 = scalar_lea.vmem %s239_s1, 256  ;;  %p345_p11 = scmp.lt.s32.totalorder %s239_s1, %s239_s1 }
  0x1f   :  { %275 = vmatprep.subr.msk.mxu0 %vm46_vm0, %v44_v1  ;;  %285 = vmatpush3.msra.mxu1 %v45_v0  ;;  %p341_p10 = scmp.ne.s32.totalorder %s239_s1, %s340_s21  ;;  %p346_p12 = scmp.lt.s32.totalorder %s340_s21, %s340_s21 }
  0x20   :  { %286 = vmatprep.subr.mxu1 %v44_v1 }
  0x21   :  { %287 = vmatpush3.msra.mxu1 %v44_v1  ;;  %p347_p13 = por %p346_p12, %p345_p11 }
  0x22   :  { %276 = vmatpush3.xpose.msk.msra.mxu0 %vm46_vm0, %v44_v1  ;;  %288 = vmatprep.subr.mxu1 %v43_v3 }
  0x23   :  { %277 = vmatprep.subr.msk.mxu0 %vm46_vm0, %v43_v3  ;;  %289 = vmatpush3.msra.mxu1 %v43_v3  ;;  %p348_p0 = pnand %p347_p13, %p341_p10 }
  0x24   :  { %290 = vmatprep.subr.mxu1 %v42_v4 }
  0x25   :  { %291 = vmatpush3.msra.mxu1 %v42_v4 }
  0x26   :  { %278 = vmatpush3.xpose.msk.msra.mxu0 %vm46_vm0, %v43_v3 }
  0x27   :  { %279 = vmatprep.subr.msk.mxu0 %vm46_vm0, %v42_v4 }
  0x2a   :  { %280 = vmatpush3.xpose.msk.msra.mxu0 %vm46_vm0, %v42_v4 }
  0x2d   :  { %282 = vmatmul.mubr.msk.f32.vlgmr.msra.gmra.mxu0 %vm46_vm0, %v41_v5 }
  0xed   :  { %v283_v6 = vpop.f32.mrf.mxu0 }
  0xee   :  { %v141_v9 = vsub.f32 %v41_v5, %v283_v6 }
  0xef   :  { %v131_v7 = vpop.f32.mrf.mxu0 }
  0xf0   :  { %v140_v8 = vsub.f32 %v40_v2, %v131_v7 }
  0xf2   :  { %292 = vmatprep.mubr.msk.f32.mxu1 %vm46_vm0, %v140_v8 }
  0xf3   :  { %293 = vmatmul.mubr.msk.f32.vlgmr.msra.gmra.mxu1 %vm46_vm0, %v141_v9 }
 0x1b3   :  { %v294_v10 = vpop.f32.mrf.mxu1 }
 0x1b4   :  { %v224_v11 = vmul.f32 0.1, %v294_v10 }
 0x1b5   :  { %v214_v12 = vpop.f32.mrf.mxu1 }
 0x1b6   :  { %v226_v13 = vadd.f32 %v224_v11, %v41_v5  ;;  %v223_v14 = vmul.f32 0.1, %v214_v12 }
 0x1b8   :  { %v260_v15 = vadd.f32 -0.5, %v226_v13  ;;  %v225_v16 = vadd.f32 %v223_v14, %v40_v2 }
 0x1ba   :  { %v230_v17 = vmax.f32 %v260_v15, 0.0  ;;  %v259_v18 = vadd.f32 -0.5, %v225_v16 }
 0x1bc   :  { %232 = vst.msk [vmem:[#allocation7 + $0x8] sm:$0xff] %vm46_vm0, %v230_v17  ;;  %v229_v19 = vmax.f32 %v259_v18, 0.0 }
 0x1be   :  { %231 = vst.msk [vmem:[#allocation7] sm:$0xff] %vm46_vm0, %v229_v19 }
 0x1bf   :  { %351 = shalt.err (!%p348_p0)
}
 0x1c0   :  { %244 = dma.vmem_to_hbm [thread:$0]  %s239_s1, 256, %s420_s2, [#allocation4], %s367_s12, %s367_s12, %s368_s13  }
 0x1c1   :  { %364 = dma.done.wait [#allocation4], 256  }
 0x1c2   :  { %365 = vsyncadd [#allocation4], 4294967040 }
 0x1c3   :  { %248 = vsyncpa [#allocation3], 1 }
 0x1c4   :  { %249 = vsyncpa [#allocation6], 1 }
 0x1c5   :  { %250 = vsyncpa [#allocation4], 1 }

</bundles_post_ra>
